<compile_context>
chip_gen: v7x
topology: tpu7x:2x2x1
jax: 0.10.0
libtpu: 0.0.40
codegen_flags: <defaults>
</compile_context>

<pallas_src>
import numpy as np
import jax
import jax.numpy as jnp
from jax.experimental import pallas as pl
from jax.experimental.pallas import tpu as pltpu


# ----------------------------- Pallas kernel --------------------------------
def _make_head_kernel(L, B, H, C, c_pad, seq_tile, with_loss):
    """Builds the classifier-head kernel for L streamed hidden-state inputs."""

    def kernel(*refs):
        idx = 0
        seq_len_ref = refs[idx]; idx += 1                     # SMEM (1,) i32
        if with_loss:
            labels_ref = refs[idx]; idx += 1                  # SMEM (B,) i32
        hidden_refs = refs[idx:idx + L]; idx += L             # L x (B, tS, H) bf16
        pooler_ref = refs[idx]; idx += 1                      # (B, H)
        w_ref = refs[idx]; idx += 1                           # (2H, c_pad) f32
        b_ref = refs[idx]; idx += 1                           # (1, c_pad) f32
        logits_ref = refs[idx]; idx += 1                      # (B, c_pad) f32 out
        if with_loss:
            loss_ref = refs[idx]; idx += 1                    # (1, 1) f32 out
        acc_ref = refs[idx]                                   # (B, H) f32 scratch

        s = pl.program_id(0)
        n_s = pl.num_programs(0)

        @pl.when(s == 0)
        def _init():
            acc_ref[...] = jnp.zeros_like(acc_ref)

        seq_len = seq_len_ref[0]                              # true (unbucketed) length

        # Sum the L layer tiles (upcast bf16 -> f32), mask padded positions,
        # then fold the tS sublanes into the running (B, H) accumulator.
        tile = hidden_refs[0][...].astype(jnp.float32)
        for l in range(1, L):
            tile = tile + hidden_refs[l][...].astype(jnp.float32)
        pos = jax.lax.broadcasted_iota(jnp.int32, (B, seq_tile, H), 1) + s * seq_tile
        tile = jnp.where(pos < seq_len, tile, 0.0)
        # exactly one (B, H) accumulator load+store per grid step (v5e store slot)
        acc_ref[...] += jnp.sum(tile, axis=1)

        @pl.when(s == n_s - 1)
        def _epilogue():
            # torch.mean over the truncated sequence length
            inv_len = 1.0 / seq_len.astype(jnp.float32)
            token_hidden = acc_ref[...] * inv_len             # (B, H)
            pooler = pooler_ref[...].astype(jnp.float32)      # (B, H)

            # concat([token_hidden, pooler]) @ W + b, concat fused into split
            # matmuls against the top/bottom halves of the (2H, c_pad) weight.
            # Dropout is identity at inference.
            w = w_ref[...]
            logits = (jnp.dot(token_hidden, w[:H, :],
                              preferred_element_type=jnp.float32)
                      + jnp.dot(pooler, w[H:, :],
                                preferred_element_type=jnp.float32)
                      + b_ref[...])                           # (B, c_pad)
            logits_ref[...] = logits                          # lane-dense store

            if with_loss:
                # CrossEntropyLoss(mean) over the first C (valid) classes.
                col = jax.lax.broadcasted_iota(jnp.int32, (B, c_pad), 1)
                valid = col < C
                masked = jnp.where(valid, logits, -jnp.inf)
                m = jnp.max(masked, axis=-1, keepdims=True)
                sum_exp = jnp.sum(jnp.where(valid, jnp.exp(masked - m), 0.0),
                                  axis=-1, keepdims=True)
                lse = m + jnp.log(sum_exp)                    # (B, 1)
                total_lse = jnp.sum(lse)

                # Picked logits via scalar label reads from SMEM (no (B,1) VMEM tile).
                col_row = jax.lax.broadcasted_iota(jnp.int32, (1, c_pad), 1)
                picked_total = jnp.float32(0.0)
                for bi in range(B):
                    lbl = labels_ref[bi]
                    one_hot = (col_row == lbl)
                    picked_total = picked_total + jnp.sum(
                        jnp.where(one_hot, logits[bi:bi + 1, :], 0.0))

                loss = (total_lse - picked_total) * (1.0 / B)
                loss_ref[...] = jnp.full((1, 1), loss, jnp.float32)

    return kernel


def classifier_head(hidden_list, pooler, w, b, true_len, labels=None, seq_tile=8):
    """Tiled Pallas head: streams L x (B, S, H) bf16, accumulates (B, H) f32.

    hidden_list : list of L arrays (B, S, H), bf16 (streamed, upcast in kernel)
    pooler      : (B, H)
    w, b        : classifier params, (2H, C) and (C,)
    true_len    : python int, true (unbucketed) sequence length
    labels      : optional (B,) int labels; loss path compiled only if given
    """
    L = len(hidden_list)
    B, S, H = hidden_list[0].shape
    C = w.shape[1]
    c_pad = ((C + 127) // 128) * 128                          # lane-dense classes
    assert S % seq_tile == 0, "sequence bucket must be a multiple of seq_tile"
    n_s = S // seq_tile
    with_loss = labels is not None

    # Lane-dense padded classifier params (zeros in padded columns).
    w_pad = jnp.zeros((2 * H, c_pad), jnp.float32).at[:, :C].set(w.astype(jnp.float32))
    b_pad = jnp.zeros((1, c_pad), jnp.float32).at[0, :C].set(b.astype(jnp.float32))

    kernel = _make_head_kernel(L, B, H, C, c_pad, seq_tile, with_loss)

    smem_spec = pl.BlockSpec(memory_space=pltpu.MemorySpace.SMEM)
    # NOTE: at production sizes, sweep pipeline_mode=pl.Buffered(2 vs 3) on these
    # streamed specs; default double-buffering is used here.
    hidden_specs = [pl.BlockSpec((B, seq_tile, H), lambda s: (0, s, 0))
                    for _ in range(L)]
    in_specs = ([smem_spec]                                            # seq_len
                + ([smem_spec] if with_loss else [])                   # labels
                + hidden_specs
                + [pl.BlockSpec((B, H), lambda s: (0, 0)),             # pooler
                   pl.BlockSpec((2 * H, c_pad), lambda s: (0, 0)),     # weight
                   pl.BlockSpec((1, c_pad), lambda s: (0, 0))])        # bias

    out_shape = [jax.ShapeDtypeStruct((B, c_pad), jnp.float32)]
    out_specs = [pl.BlockSpec((B, c_pad), lambda s: (0, 0))]
    if with_loss:
        out_shape.append(jax.ShapeDtypeStruct((1, 1), jnp.float32))
        out_specs.append(pl.BlockSpec((1, 1), lambda s: (0, 0)))

    args = [jnp.full((1,), true_len, jnp.int32)]
    if with_loss:
        args.append(jnp.asarray(labels, jnp.int32).reshape(B))
    args += list(hidden_list)                                  # bf16, no extra cast
    args += [pooler, w_pad, b_pad]

    results = pl.pallas_call(
        kernel,
        out_shape=tuple(out_shape),
        grid=(n_s,),
        in_specs=in_specs,
        out_specs=tuple(out_specs),
        scratch_shapes=[pltpu.VMEM((B, H), jnp.float32)],
        compiler_params=pltpu.CompilerParams(
            # single reduction axis over S-tiles; keep tiles a few MiB so
            # double-buffering fits v7x's smaller VMEM as well.
            dimension_semantics=("arbitrary",),
            vmem_limit_bytes=32 * 1024 * 1024),
    )(*args)

    logits = results[0][:, :C]                                 # drop lane padding
    if with_loss:
        return logits, results[1][0, 0]
    return logits


# ------------------------ synthetic transformer (glue) ----------------------
def make_params(key, vocab, max_pos, H, n_transformer_layers, C):
    ks = jax.random.split(key, 6 + 2 * n_transformer_layers)
    p = {
        "tok_emb": 0.02 * jax.random.normal(ks[0], (vocab, H), jnp.float32),
        "pos_emb": 0.02 * jax.random.normal(ks[1], (max_pos, H), jnp.float32),
        "type_emb": 0.02 * jax.random.normal(ks[2], (2, H), jnp.float32),
        "pool_w": 0.02 * jax.random.normal(ks[3], (H, H), jnp.float32),
        "pool_b": jnp.zeros((H,), jnp.float32),
        "out_w": 0.02 * jax.random.normal(ks[4], (2 * H, C), jnp.float32),
        "out_b": 0.01 * jnp.arange(C, dtype=jnp.float32),
        "layers": [],
    }
    for i in range(n_transformer_layers):
        w = 0.05 * jax.random.normal(ks[6 + 2 * i], (H, H), jnp.float32)
        bias = 0.01 * jax.random.normal(ks[7 + 2 * i], (H,), jnp.float32)
        p["layers"].append((w, bias))
    return p


def tiny_transformer(params, input_ids, attention_mask, token_type_ids):
    """Deterministic stand-in for the HF transformer.
    Hidden states are emitted in bf16 (the dtype streamed into the kernel);
    the pooler output stays f32."""
    B, S = input_ids.shape
    x = (params["tok_emb"][input_ids]
         + params["pos_emb"][jnp.arange(S)][None, :, :]
         + params["type_emb"][token_type_ids])
    mask = attention_mask[..., None].astype(jnp.float32)       # (B, S, 1)
    all_hidden = [x.astype(jnp.bfloat16)]
    h = x
    for (w, bias) in params["layers"]:
        h = jnp.tanh(h @ w + bias) * mask
        all_hidden.append(h.astype(jnp.bfloat16))
    pooler = jnp.tanh(h[:, 0, :] @ params["pool_w"] + params["pool_b"])
    return all_hidden[-1], pooler, tuple(all_hidden)


# ------------------------------ module forward ------------------------------
def _bucket_length(true_len, seq_tile, s_full):
    return min(((true_len + seq_tile - 1) // seq_tile) * seq_tile, s_full)


def sequence_classifier_forward(params, input_ids, attention_mask,
                                classification_labels=None, n_layers=4,
                                seq_tile=8):
    # The torch module truncates to the last attended position (a host sync, as
    # torch's .item() is).  We round the truncation up to a small static set of
    # length buckets (multiples of seq_tile) so kernels stay cached; the exact
    # truncation semantics (mean over true_len positions) are recovered inside
    # the kernel via a position mask and division by true_len.
    am = np.asarray(attention_mask)
    true_len = int(np.nonzero((am != 0).max(axis=0))[0][-1]) + 1
    s_full = input_ids.shape[1]
    bucket = _bucket_length(true_len, seq_tile, s_full)
    if bucket < s_full:
        input_ids = input_ids[:, :bucket]
        attention_mask = attention_mask[:, :bucket]
    segment_id = jnp.zeros_like(attention_mask)

    _, pooler, all_hidden = tiny_transformer(params, input_ids, attention_mask,
                                             segment_id)
    hidden_list = list(all_hidden[-n_layers:])                 # L x (B, S, H) bf16

    # TODO(synk): dropout is identity here (inference mode, no RNG mask applied).
    if classification_labels is not None:
        logits, loss = classifier_head(hidden_list, pooler,
                                       params["out_w"], params["out_b"],
                                       true_len, labels=classification_labels,
                                       seq_tile=seq_tile)
        return [logits, loss]
    logits = classifier_head(hidden_list, pooler,
                             params["out_w"], params["out_b"],
                             true_len, labels=None, seq_tile=seq_tile)
    return [logits]


# pure-JAX reference for the kernel portion (correctness check)
def _reference_head(hidden_list, pooler, w, b, labels, true_len):
    stacked = jnp.stack([h[:, :true_len, :].astype(jnp.float32)
                         for h in hidden_list], axis=0)
    token_hidden = jnp.mean(jnp.sum(stacked, axis=0), axis=1)
    hidden_cat = jnp.concatenate([token_hidden, pooler.astype(jnp.float32)], axis=1)
    logits = hidden_cat @ w + b
    lse = jax.scipy.special.logsumexp(logits, axis=-1)
    picked = jnp.take_along_axis(logits, labels[:, None], axis=1)[:, 0]
    return logits, jnp.mean(lse - picked)


if __name__ == "__main__":
    B, S, H, C = 2, 32, 32, 2
    vocab, n_transformer_layers, n_layers = 32, 4, 4
    seq_tile = 8

    key = jax.random.PRNGKey(0)
    k_ids, k_params, k_labels = jax.random.split(key, 3)

    params = make_params(k_params, vocab, S, H, n_transformer_layers, C)
    input_ids = jax.random.randint(k_ids, (B, S), 0, vocab, dtype=jnp.int32)
    # positions 19..31 padded -> true_len=19, bucketed to 24 (3 S-tiles of 8)
    attention_mask = jnp.concatenate(
        [jnp.ones((B, 19), jnp.int32), jnp.zeros((B, S - 19), jnp.int32)], axis=1)
    labels = jax.random.randint(k_labels, (B,), 0, C, dtype=jnp.int32)

    # training-style call (with loss) and inference-style call (logits only)
    logits, loss = sequence_classifier_forward(params, input_ids, attention_mask,
                                               classification_labels=labels,
                                               n_layers=n_layers,
                                               seq_tile=seq_tile)
    (logits_inf,) = sequence_classifier_forward(params, input_ids, attention_mask,
                                                classification_labels=None,
                                                n_layers=n_layers,
                                                seq_tile=seq_tile)
    jax.block_until_ready((logits, loss, logits_inf))

    # verify kernel against a pure-JAX reference of the same head
    am_np = np.asarray(attention_mask)
    true_len = int(np.nonzero((am_np != 0).max(axis=0))[0][-1]) + 1
    bucket = _bucket_length(true_len, seq_tile, S)
    ids_b = input_ids[:, :bucket]
    am_b = attention_mask[:, :bucket]
    _, ref_pooler, ref_hidden = tiny_transformer(params, ids_b, am_b,
                                                 jnp.zeros_like(am_b))
    ref_logits, ref_loss = _reference_head(list(ref_hidden[-n_layers:]), ref_pooler,
                                           params["out_w"], params["out_b"],
                                           labels, true_len)
    np.testing.assert_allclose(np.asarray(logits), np.asarray(ref_logits),
                               rtol=1e-4, atol=1e-5)
    np.testing.assert_allclose(np.asarray(logits_inf), np.asarray(ref_logits),
                               rtol=1e-4, atol=1e-5)
    np.testing.assert_allclose(float(loss), float(ref_loss), rtol=1e-4, atol=1e-5)

    print("KERNEL_OK")
</pallas_src>

<mosaic_0001>
module attributes {stable_mosaic.version = 11 : i64} {
  func.func @kernel(%arg0: i32, %arg1: memref<1xi32, #tpu.memory_space<smem>>, %arg2: memref<2xi32, #tpu.memory_space<smem>>, %arg3: memref<2x8x32xbf16, #tpu.memory_space<vmem>>, %arg4: memref<2x8x32xbf16, #tpu.memory_space<vmem>>, %arg5: memref<2x8x32xbf16, #tpu.memory_space<vmem>>, %arg6: memref<2x8x32xbf16, #tpu.memory_space<vmem>>, %arg7: memref<2x32xf32, #tpu.memory_space<vmem>>, %arg8: memref<64x128xf32, #tpu.memory_space<vmem>>, %arg9: memref<1x128xf32, #tpu.memory_space<vmem>>, %arg10: memref<2x128xf32, #tpu.memory_space<vmem>>, %arg11: memref<1x1xf32, #tpu.memory_space<vmem>>, %arg12: memref<2x32xf32, #tpu.memory_space<vmem>>) attributes {dimension_semantics = [#tpu.dimension_semantics<arbitrary>], iteration_bounds = array<i64: 3>, scalar_prefetch = 0 : i64, scratch_operands = 1 : i64, tpu.core_type = #tpu.core_type<tc>, window_params = [{transform_indices = @transform_0, window_bounds = array<i64: 1>}, {transform_indices = @transform_1, window_bounds = array<i64: 2>}, {transform_indices = @transform_2, window_bounds = array<i64: 2, 8, 32>}, {transform_indices = @transform_3, window_bounds = array<i64: 2, 8, 32>}, {transform_indices = @transform_4, window_bounds = array<i64: 2, 8, 32>}, {transform_indices = @transform_5, window_bounds = array<i64: 2, 8, 32>}, {pipeline_mode = #tpu.pipeline_mode<synchronous>, transform_indices = @transform_6, window_bounds = array<i64: 2, 32>}, {pipeline_mode = #tpu.pipeline_mode<synchronous>, transform_indices = @transform_7, window_bounds = array<i64: 64, 128>}, {pipeline_mode = #tpu.pipeline_mode<synchronous>, transform_indices = @transform_8, window_bounds = array<i64: 1, 128>}, {pipeline_mode = #tpu.pipeline_mode<synchronous>, transform_indices = @transform_9, window_bounds = array<i64: 2, 128>}, {pipeline_mode = #tpu.pipeline_mode<synchronous>, transform_indices = @transform_10, window_bounds = array<i64: 1, 1>}]} {
    %c0_i32 = arith.constant 0 : i32
    %0 = arith.cmpi eq, %arg0, %c0_i32 : i32
    %1 = arith.extui %0 : i1 to i32
    %c0_i32_0 = arith.constant 0 : i32
    %2 = arith.cmpi ne, %1, %c0_i32_0 : i32
    scf.if %2 {
      %cst_19 = arith.constant 0.000000e+00 : f32
      %30 = vector.broadcast %cst_19 : f32 to vector<2x32xf32>
      %c0_20 = arith.constant 0 : index
      %c0_21 = arith.constant 0 : index
      %31 = vector.load %arg12[%c0_20, %c0_21] : memref<2x32xf32, #tpu.memory_space<vmem>>, vector<2x32xf32>
      tpu.vector_store %arg12[%c0_20, %c0_21], %30 {strides = array<i32>} : memref<2x32xf32, #tpu.memory_space<vmem>>, vector<2x32xf32>,
    } else {
    }
    %c0 = arith.constant 0 : index
    %3 = memref.load %arg1[%c0] : memref<1xi32, #tpu.memory_space<smem>>
    %c0_1 = arith.constant 0 : index
    %c0_2 = arith.constant 0 : index
    %c0_3 = arith.constant 0 : index
    %4 = vector.load %arg3[%c0_1, %c0_2, %c0_3] : memref<2x8x32xbf16, #tpu.memory_space<vmem>>, vector<2x8x32xbf16>
    %5 = arith.extf %4 : vector<2x8x32xbf16> to vector<2x8x32xf32>
    %c0_4 = arith.constant 0 : index
    %c0_5 = arith.constant 0 : index
    %c0_6 = arith.constant 0 : index
    %6 = vector.load %arg4[%c0_4, %c0_5, %c0_6] : memref<2x8x32xbf16, #tpu.memory_space<vmem>>, vector<2x8x32xbf16>
    %7 = arith.extf %6 : vector<2x8x32xbf16> to vector<2x8x32xf32>
    %8 = arith.addf %5, %7 : vector<2x8x32xf32>
    %c0_7 = arith.constant 0 : index
    %c0_8 = arith.constant 0 : index
    %c0_9 = arith.constant 0 : index
    %9 = vector.load %arg5[%c0_7, %c0_8, %c0_9] : memref<2x8x32xbf16, #tpu.memory_space<vmem>>, vector<2x8x32xbf16>
    %10 = arith.extf %9 : vector<2x8x32xbf16> to vector<2x8x32xf32>
    %11 = arith.addf %8, %10 : vector<2x8x32xf32>
    %c0_10 = arith.constant 0 : index
    %c0_11 = arith.constant 0 : index
    %c0_12 = arith.constant 0 : index
    %12 = vector.load %arg6[%c0_10, %c0_11, %c0_12] : memref<2x8x32xbf16, #tpu.memory_space<vmem>>, vector<2x8x32xbf16>
    %13 = arith.extf %12 : vector<2x8x32xbf16> to vector<2x8x32xf32>
    %14 = arith.addf %11, %13 : vector<2x8x32xf32>
    %15 = tpu.iota {dimensions = array<i32: 1>} : vector<2x8x32xi32>
    %c8_i32 = arith.constant 8 : i32
    %16 = arith.muli %arg0, %c8_i32 : i32
    %17 = vector.broadcast %16 : i32 to vector<2x8x32xi32>
    %18 = arith.addi %15, %17 : vector<2x8x32xi32>
    %19 = vector.broadcast %3 : i32 to vector<2x8x32xi32>
    %20 = arith.cmpi slt, %18, %19 : vector<2x8x32xi32>
    %cst = arith.constant 0.000000e+00 : f32
    %21 = vector.broadcast %cst : f32 to vector<2x8x32xf32>
    %22 = arith.select %20, %14, %21 : vector<2x8x32xi1>, vector<2x8x32xf32>
    %c0_13 = arith.constant 0 : index
    %c0_14 = arith.constant 0 : index
    %23 = vector.load %arg12[%c0_13, %c0_14] : memref<2x32xf32, #tpu.memory_space<vmem>>, vector<2x32xf32>
    %cst_15 = arith.constant dense<0.000000e+00> : vector<2x32xf32>
    %24 = vector.multi_reduction <add>, %22, %cst_15 [1] : vector<2x8x32xf32> to vector<2x32xf32>
    %25 = arith.addf %23, %24 : vector<2x32xf32>
    %c0_16 = arith.constant 0 : index
    %c0_17 = arith.constant 0 : index
    %26 = vector.load %arg12[%c0_16, %c0_17] : memref<2x32xf32, #tpu.memory_space<vmem>>, vector<2x32xf32>
    tpu.vector_store %arg12[%c0_16, %c0_17], %25 {strides = array<i32>} : memref<2x32xf32, #tpu.memory_space<vmem>>, vector<2x32xf32>,
    %c2_i32 = arith.constant 2 : i32
    %27 = arith.cmpi eq, %arg0, %c2_i32 : i32
    %28 = arith.extui %27 : i1 to i32
    %c0_i32_18 = arith.constant 0 : i32
    %29 = arith.cmpi ne, %28, %c0_i32_18 : i32
    scf.if %29 {
      %30 = arith.sitofp %3 : i32 to f32
      %cst_19 = arith.constant 1.000000e+00 : f32
      %31 = arith.divf %cst_19, %30 : f32
      %c0_20 = arith.constant 0 : index
      %c0_21 = arith.constant 0 : index
      %32 = vector.load %arg12[%c0_20, %c0_21] : memref<2x32xf32, #tpu.memory_space<vmem>>, vector<2x32xf32>
      %33 = vector.broadcast %31 : f32 to vector<2x32xf32>
      %34 = arith.mulf %32, %33 : vector<2x32xf32>
      %c0_22 = arith.constant 0 : index
      %c0_23 = arith.constant 0 : index
      %35 = vector.load %arg7[%c0_22, %c0_23] : memref<2x32xf32, #tpu.memory_space<vmem>>, vector<2x32xf32>
      %c0_24 = arith.constant 0 : index
      %c0_25 = arith.constant 0 : index
      %36 = vector.load %arg8[%c0_24, %c0_25] : memref<64x128xf32, #tpu.memory_space<vmem>>, vector<64x128xf32>
      %37 = vector.extract_strided_slice %36 {offsets = [0, 0], sizes = [32, 128], strides = [1, 1]} : vector<64x128xf32> to vector<32x128xf32>
      %cst_26 = arith.constant dense<0.000000e+00> : vector<2x128xf32>
      %38 = tpu.matmul %34, %37, %cst_26 {dimension_numbers = #tpu.dot_dimension_numbers<[1], [0], [0], [1], [0, 0, 1, 1], [], []>} : vector<2x32xf32>, vector<32x128xf32>, vector<2x128xf32> -> vector<2x128xf32>
      %39 = vector.extract_strided_slice %36 {offsets = [32, 0], sizes = [32, 128], strides = [1, 1]} : vector<64x128xf32> to vector<32x128xf32>
      %cst_27 = arith.constant dense<0.000000e+00> : vector<2x128xf32>
      %40 = tpu.matmul %35, %39, %cst_27 {dimension_numbers = #tpu.dot_dimension_numbers<[1], [0], [0], [1], [0, 0, 1, 1], [], []>} : vector<2x32xf32>, vector<32x128xf32>, vector<2x128xf32> -> vector<2x128xf32>
      %41 = arith.addf %38, %40 : vector<2x128xf32>
      %c0_28 = arith.constant 0 : index
      %c0_29 = arith.constant 0 : index
      %42 = vector.load %arg9[%c0_28, %c0_29] : memref<1x128xf32, #tpu.memory_space<vmem>>, vector<1x128xf32>
      %43 = vector.broadcast %42 : vector<1x128xf32> to vector<2x128xf32>
      %44 = arith.addf %41, %43 : vector<2x128xf32>
      %c0_30 = arith.constant 0 : index
      %c0_31 = arith.constant 0 : index
      %45 = vector.load %arg10[%c0_30, %c0_31] : memref<2x128xf32, #tpu.memory_space<vmem>>, vector<2x128xf32>
      tpu.vector_store %arg10[%c0_30, %c0_31], %44 {strides = array<i32>} : memref<2x128xf32, #tpu.memory_space<vmem>>, vector<2x128xf32>,
      %46 = tpu.iota {dimensions = array<i32: 1>} : vector<2x128xi32>
      %c2_i32_32 = arith.constant 2 : i32
      %47 = vector.broadcast %c2_i32_32 : i32 to vector<2x128xi32>
      %48 = arith.cmpi slt, %46, %47 : vector<2x128xi32>
      %cst_33 = arith.constant 0xFF800000 : f32
      %49 = vector.broadcast %cst_33 : f32 to vector<2x128xf32>
      %50 = arith.select %48, %44, %49 : vector<2x128xi1>, vector<2x128xf32>
      %cst_34 = arith.constant dense<0xFF800000> : vector<2xf32>
      %51 = vector.multi_reduction <maximumf>, %50, %cst_34 [1] : vector<2x128xf32> to vector<2xf32>
      %52 = vector.shape_cast %51 : vector<2xf32> to vector<2x1xf32>
      %53 = vector.broadcast %52 : vector<2x1xf32> to vector<2x128xf32>
      %54 = arith.subf %50, %53 : vector<2x128xf32>
      %55 = math.exp %54 : vector<2x128xf32>
      %cst_35 = arith.constant 0.000000e+00 : f32
      %56 = vector.broadcast %cst_35 : f32 to vector<2x128xf32>
      %57 = arith.select %48, %55, %56 : vector<2x128xi1>, vector<2x128xf32>
      %cst_36 = arith.constant dense<0.000000e+00> : vector<2xf32>
      %58 = vector.multi_reduction <add>, %57, %cst_36 [1] : vector<2x128xf32> to vector<2xf32>
      %59 = vector.shape_cast %58 : vector<2xf32> to vector<2x1xf32>
      %60 = math.log %59 : vector<2x1xf32>
      %61 = arith.addf %52, %60 : vector<2x1xf32>
      %62 = vector.shape_cast %61 : vector<2x1xf32> to vector<1x2x1xf32>
      %cst_37 = arith.constant dense<0.000000e+00> : vector<1xf32>
      %63 = vector.multi_reduction <add>, %62, %cst_37 [1, 2] : vector<1x2x1xf32> to vector<1xf32>
      %64 = vector.shape_cast %63 : vector<1xf32> to vector<1x1x1xf32>
      %65 = vector.extract %64[0, 0, 0] : f32 from vector<1x1x1xf32>
      %66 = tpu.iota {dimensions = array<i32: 1>} : vector<1x128xi32>
      %c0_38 = arith.constant 0 : index
      %67 = memref.load %arg2[%c0_38] : memref<2xi32, #tpu.memory_space<smem>>
      %68 = vector.broadcast %67 : i32 to vector<1x128xi32>
      %69 = arith.cmpi eq, %66, %68 : vector<1x128xi32>
      %70 = vector.extract_strided_slice %44 {offsets = [0, 0], sizes = [1, 128], strides = [1, 1]} : vector<2x128xf32> to vector<1x128xf32>
      %cst_39 = arith.constant 0.000000e+00 : f32
      %71 = vector.broadcast %cst_39 : f32 to vector<1x128xf32>
      %72 = arith.select %69, %70, %71 : vector<1x128xi1>, vector<1x128xf32>
      %73 = vector.shape_cast %72 : vector<1x128xf32> to vector<1x1x128xf32>
      %cst_40 = arith.constant dense<0.000000e+00> : vector<1xf32>
      %74 = vector.multi_reduction <add>, %73, %cst_40 [1, 2] : vector<1x1x128xf32> to vector<1xf32>
      %75 = vector.shape_cast %74 : vector<1xf32> to vector<1x1x1xf32>
      %76 = vector.extract %75[0, 0, 0] : f32 from vector<1x1x1xf32>
      %cst_41 = arith.constant 0.000000e+00 : f32
      %77 = arith.addf %cst_41, %76 : f32
      %c1 = arith.constant 1 : index
      %78 = memref.load %arg2[%c1] : memref<2xi32, #tpu.memory_space<smem>>
      %79 = vector.broadcast %78 : i32 to vector<1x128xi32>
      %80 = arith.cmpi eq, %66, %79 : vector<1x128xi32>
      %81 = vector.extract_strided_slice %44 {offsets = [1, 0], sizes = [1, 128], strides = [1, 1]} : vector<2x128xf32> to vector<1x128xf32>
      %cst_42 = arith.constant 0.000000e+00 : f32
      %82 = vector.broadcast %cst_42 : f32 to vector<1x128xf32>
      %83 = arith.select %80, %81, %82 : vector<1x128xi1>, vector<1x128xf32>
      %84 = vector.shape_cast %83 : vector<1x128xf32> to vector<1x1x128xf32>
      %cst_43 = arith.constant dense<0.000000e+00> : vector<1xf32>
      %85 = vector.multi_reduction <add>, %84, %cst_43 [1, 2] : vector<1x1x128xf32> to vector<1xf32>
      %86 = vector.shape_cast %85 : vector<1xf32> to vector<1x1x1xf32>
      %87 = vector.extract %86[0, 0, 0] : f32 from vector<1x1x1xf32>
      %88 = arith.addf %77, %87 : f32
      %89 = arith.subf %65, %88 : f32
      %cst_44 = arith.constant 5.000000e-01 : f32
      %90 = arith.mulf %89, %cst_44 : f32
      %91 = vector.broadcast %90 : f32 to vector<1x1xf32>
      %c0_45 = arith.constant 0 : index
      %c0_46 = arith.constant 0 : index
      %92 = vector.load %arg11[%c0_45, %c0_46] : memref<1x1xf32, #tpu.memory_space<vmem>>, vector<1x1xf32>
      tpu.vector_store %arg11[%c0_45, %c0_46], %91 {strides = array<i32>} : memref<1x1xf32, #tpu.memory_space<vmem>>, vector<1x1xf32>,
    } else {
    }
    return
  }
  func.func @transform_0(%arg0: i32) -> i32 {
    %c0_i32 = arith.constant 0 : i32
    %c0_i32_0 = arith.constant 0 : i32
    return %c0_i32 : i32
  }
  func.func @transform_1(%arg0: i32) -> i32 {
    %c0_i32 = arith.constant 0 : i32
    %c0_i32_0 = arith.constant 0 : i32
    return %c0_i32 : i32
  }
  func.func @transform_2(%arg0: i32) -> (i32, i32, i32) {
    %c0_i32 = arith.constant 0 : i32
    %c0_i32_0 = arith.constant 0 : i32
    %c0_i32_1 = arith.constant 0 : i32
    return %c0_i32, %arg0, %c0_i32_0 : i32, i32, i32
  }
  func.func @transform_3(%arg0: i32) -> (i32, i32, i32) {
    %c0_i32 = arith.constant 0 : i32
    %c0_i32_0 = arith.constant 0 : i32
    %c0_i32_1 = arith.constant 0 : i32
    return %c0_i32, %arg0, %c0_i32_0 : i32, i32, i32
  }
  func.func @transform_4(%arg0: i32) -> (i32, i32, i32) {
    %c0_i32 = arith.constant 0 : i32
    %c0_i32_0 = arith.constant 0 : i32
    %c0_i32_1 = arith.constant 0 : i32
    return %c0_i32, %arg0, %c0_i32_0 : i32, i32, i32
  }
  func.func @transform_5(%arg0: i32) -> (i32, i32, i32) {
    %c0_i32 = arith.constant 0 : i32
    %c0_i32_0 = arith.constant 0 : i32
    %c0_i32_1 = arith.constant 0 : i32
    return %c0_i32, %arg0, %c0_i32_0 : i32, i32, i32
  }
  func.func @transform_6(%arg0: i32) -> (i32, i32) {
    %c0_i32 = arith.constant 0 : i32
    %c0_i32_0 = arith.constant 0 : i32
    %c0_i32_1 = arith.constant 0 : i32
    return %c0_i32, %c0_i32_0 : i32, i32
  }
  func.func @transform_7(%arg0: i32) -> (i32, i32) {
    %c0_i32 = arith.constant 0 : i32
    %c0_i32_0 = arith.constant 0 : i32
    %c0_i32_1 = arith.constant 0 : i32
    return %c0_i32, %c0_i32_0 : i32, i32
  }
  func.func @transform_8(%arg0: i32) -> (i32, i32) {
    %c0_i32 = arith.constant 0 : i32
    %c0_i32_0 = arith.constant 0 : i32
    %c0_i32_1 = arith.constant 0 : i32
    return %c0_i32, %c0_i32_0 : i32, i32
  }
  func.func @transform_9(%arg0: i32) -> (i32, i32) {
    %c0_i32 = arith.constant 0 : i32
    %c0_i32_0 = arith.constant 0 : i32
    %c0_i32_1 = arith.constant 0 : i32
    return %c0_i32, %c0_i32_0 : i32, i32
  }
  func.func @transform_10(%arg0: i32) -> (i32, i32) {
    %c0_i32 = arith.constant 0 : i32
    %c0_i32_0 = arith.constant 0 : i32
    %c0_i32_1 = arith.constant 0 : i32
    return %c0_i32, %c0_i32_0 : i32, i32
  }
}

</mosaic_0001>

<bundles_post_ra>
// kernel: tpu_custom_call.1
= control target key start
LH: loop header
LB: loop body
LE: loop exit
PB: predicated region body
PF: predicated region fallthrough
CT: control target
= control target key end

     0   :  { %s1911_s0 = inlined_call_operand.<no memory space> [shape: s32[1], index: 0, kind: input, shape index: {}]   ;;  %s1912_s1 = inlined_call_operand.vmem [shape: s32[2], index: 1, kind: input, shape index: {}]   ;;  %s1913_s2 = inlined_call_operand.hbm [shape: bf16[2,24,32], index: 2, kind: input, shape index: {}]   ;;  %s1914_s3 = inlined_call_operand.hbm [shape: bf16[2,24,32], index: 3, kind: input, shape index: {}]   ;;  %s1915_s4 = inlined_call_operand.hbm [shape: bf16[2,24,32], index: 4, kind: input, shape index: {}]   ;;  %s1916_s5 = inlined_call_operand.hbm [shape: bf16[2,24,32], index: 5, kind: input, shape index: {}]   ;;  %s1917_s6 = inlined_call_operand.vmem [shape: f32[2,32], index: 6, kind: input, shape index: {}]   ;;  %s1918_s7 = inlined_call_operand.hbm [shape: f32[64,128], index: 7, kind: input, shape index: {}]   ;;  %s1919_s8 = inlined_call_operand.vmem [shape: f32[1,128], index: 8, kind: input, shape index: {}]   ;;  %s1920_s9 = inlined_call_operand.hbm [shape: f32[2,128], index: 9, kind: output, shape index: {0}]   ;;  %s1921_s10 = inlined_call_operand.hbm [shape: f32[1,1], index: 10, kind: output, shape index: {1}]  }
   0x1   :  { %1942 = sst [smem:[#allocation28_spill]] %s1912_s1 }
   0x2   :  { %1943 = sst [smem:[#allocation29_spill]] %s1913_s2 }
   0x3   :  { %1944 = sst [smem:[#allocation30_spill]] %s1914_s3 }
   0x4   :  { %1945 = sst [smem:[#allocation31_spill]] %s1918_s7 }
   0x5   :  { %1946 = sst [smem:[#allocation32_spill]] %s1920_s9 }
   0x6   :  { %1947 = sst [smem:[#allocation33_spill]] %s1921_s10 }
   0x7   :  { %16 = sst [smem:[#allocation3]] %s1911_s0 }
   0x8   :  { %17 = vsyncpa [#allocation7], 0 }
   0x9   :  { %18 = vsyncpa [#allocation5], 0 }
   0xa   :  { %20 = vsyncpa [#allocation5 + $0x1], 0 }
   0xb   :  { %21 = vsyncpa [#allocation10], 0 }
   0xc   :  { %23 = vsyncpa [#allocation10 + $0x1], 0 }
   0xd   :  { %24 = vsyncpa [#allocation13], 0 }
   0xe   :  { %26 = vsyncpa [#allocation13 + $0x1], 0 }
   0xf   :  { %27 = vsyncpa [#allocation6], 0 }
  0x10   :  { %28 = vsyncpa [#allocation17], 0  ;;  %s1533_s15 = smov 0   ;;  %s1535_s16 = smov 0  }
  0x11   :  { %s1537_s17 = smov 0   ;;  %s1539_s18 = smov 0  }
  0x12 LB: > { %1948 = sst [smem:[#allocation25_spill]] %s1452_s17  ;;  %s1552_s0 = sadd.s32 4294967295, %s1456_s18   ;;  %s1456_s18 = sphi %s1539_s18, %s1980_s18   ;;  %s1452_s17 = sphi %s1537_s17, %s1982_s17   ;;  %s1448_s16 = sphi %s1535_s16, %s1984_s16   ;;  %s1444_s15 = sphi %s1533_s15, %s1983_s15  }
  0x13   : > { %s1555_s19 = sadd.s32 1, %s1456_s18   ;;  %s83_s21 = sadd.s32 1, %s1452_s17 }
  0x14   : > { %1949 = sst [smem:[#allocation26_spill]] %s1555_s19  ;;  %s80_s20 = ssub.s32 %s1456_s18, %s1555_s19 }
  0x15   : > { %p81_p0 = scmp.eq.s32.totalorder %s80_s20, 0  ;;  %p90_p1 = scmp.ne.s32.totalorder %s1452_s17, %s1448_s16 }
  0x16   : > { %p91_p2 = scmp.eq.s32.totalorder %s1456_s18, 0  ;;  %p96_p3 = scmp.ne.s32.totalorder %s1448_s16, %s1444_s15 }
  0x17   : > { %s1565_s22 = scalar_select %p81_p0, %s1452_s17, %s83_s21  }
  0x18   : > { %p1567_p4 = por %p91_p2, %p90_p1  ;;  %p1922_p5 = scmp.eq.s32.totalorder %s1552_s0, 0 }
  0x19   : > { %1950 = sst [smem:[#allocation27_spill]] %s1565_s22  ;;  %p979_p6 = scmp.ge.s32.totalorder %s1456_s18, 1 }
  0x1a   : > { %p290_p7 = scmp.lt.s32.totalorder %s1456_s18, 4  ;;  %p1576_p8 = por %p1922_p5, %p96_p3 }
  0x1b   : > { %s1458_s26 = smov [#allocation14]   ;;  %p1125_p13 = scmp.lt.s32.totalorder %s1456_s18, 3 }
  0x1c   : > { %s1952_s24 = scalar_select %p1576_p8, 1, 0 }
  0x1d   : > { %p1581_p10 = pnand %p979_p6, %p290_p7  ;;  %s319_s27 = sshll.u32 %s1458_s26, 4  ;;  %s320_s27 = int_to_ptr.vmem [resolvable:$true] %s319_s27 }
  0x1e   : > { %s1933_s29 = sand.u32 1, %s1452_s17   ;;  %s1596_s30 = sshll.u32 %s1456_s18, 6 }
  0x1f   : > { %s1953_s25 = scalar_select %p1581_p10, 1, 0 }
  0x20   : > { %p1103_p11 = pneg %p1581_p10  ;;  %p1600_p0 = pnand %p1125_p13, %p1567_p4 }
  0x21   : > { %s1956_s7 = sld [smem:[#allocation31_spill]] }
  0x22   : > { %p1589_p12 = pnand %p1103_p11, %p1922_p5 }
  0x23   : > { %s1955_s11 = scalar_select %p1600_p0, 1, 0 }
  0x24   : > { %s1954_s28 = scalar_select %p1589_p12, 1, 0 }
  0x25   : > { %p1930_p2 = pneg %p1589_p12 }
  0x27   : > { %s1183_s14 = scalar_lea.hbm %s1956_s7, 1024 }
  0x28   : > { %p1184_p1 = scmp.ne.s32.totalorder %s1956_s7, %s1183_s14  ;;  %p1190_p4 = scmp.lt.u32.totalorder %s1183_s14, %s1956_s7 }
  0x2a   : > { %p1186_p3 = pnand %p1930_p2, %p1184_p1 }
  0x2c   : > { %p1187_p6 = pneg %p1186_p3 }
  0x2e   : > { %p1192_p7 = pnand %p1190_p4, %p1187_p6 }
  0x30   : > { %1195 = shalt.err (!%p1192_p7)
}
  0x31   : > { %s1196_s26 = scalar_lea.vmem %s320_s27, 1024  ;;  %p1204_p5 = scmp.lt.s32.totalorder %s320_s27, %s320_s27 }
  0x32   : > { %p1197_p11 = scmp.ne.s32.totalorder %s320_s27, %s1196_s26  ;;  %p1205_p8 = scmp.lt.s32.totalorder %s1196_s26, %s1196_s26 }
  0x34   : > { %p1199_p13 = pnand %p1197_p11, %p1930_p2  ;;  %p1206_p10 = por %p1205_p8, %p1204_p5 }
  0x36   : > { %p1200_p9 = pneg %p1199_p13 }
  0x38   : > { %p1207_p0 = pnand %p1206_p10, %p1200_p9 }
  0x3a   : > { %1210 = shalt.err (!%p1207_p0)
}
  0x3b   : > { %s1459_s12 = smov 128   ;;  %s1460_s13 = smov 8  }
  0x3c   : > { %1109 = dma.hbm_to_vmem [thread:$0]  (!%p1589_p12), %s1956_s7, 1024, %s320_s27, [#allocation13], %s1459_s12, %s1459_s12, %s1460_s13  }
  0x3d   : > { %s1628_s20 = sshll.u32 %s1933_s29, 3  ;;  %s1929_s21 = sand.u32 1, %s1456_s18  }
  0x3e   : > { %s1957_s3 = sld [smem:[#allocation30_spill]]  ;;  %s360_s19 = scalar_lea.vmem [#allocation9], %s1628_s20 }
  0x3f   : > { %s366_s10 = sshll.u32 %s360_s19, 4  ;;  %s1642_s27 = scalar_lea.sflag [#allocation10], %s1929_s21  ;;  %s1638_s10 = int_to_ptr.vmem [resolvable:$true] %s366_s10 }
  0x40   : > { %p1958_p8 = scmp.ne.s32.totalorder %s1955_s11, 0 }
  0x42   : > { %p1648_p9 = pneg %p1958_p8 }
  0x44   : > { %s1635_s22 = scalar_lea.hbm %s1957_s3, %s1596_s30  ;;  %s1216_s19 = scalar_lea.hbm %s1957_s3, 384 }
  0x45   : > { %s1211_s12 = scalar_lea.hbm %s1635_s22, 128  ;;  %p1217_p1 = scmp.lt.u32.totalorder %s1635_s22, %s1957_s3 }
  0x46   : > { %p1212_p5 = scmp.ne.s32.totalorder %s1635_s22, %s1211_s12  ;;  %p1218_p3 = scmp.lt.u32.totalorder %s1216_s19, %s1211_s12 }
  0x47   : > { %p1220_p4 = scmp.lt.u32.totalorder %s1211_s12, %s1635_s22 }
  0x48   : > { %p1214_p10 = pnand %p1648_p9, %p1212_p5  ;;  %p1219_p6 = por %p1218_p3, %p1217_p1 }
  0x4a   : > { %p1215_p0 = pneg %p1214_p10  ;;  %p1221_p7 = por %p1220_p4, %p1219_p6 }
  0x4c   : > { %p1222_p11 = pnand %p1221_p7, %p1215_p0 }
  0x4e   : > { %1225 = shalt.err (!%p1222_p11)
}
  0x4f   : > { %s1226_s21 = scalar_lea.vmem %s1638_s10, 128  ;;  %s1461_s14 = smov [#allocation9]  }
  0x50   : > { %p1227_p13 = scmp.ne.s32.totalorder %s1638_s10, %s1226_s21  ;;  %s1231_s15 = sshll.u32 %s1461_s14, 4  ;;  %s1232_s15 = int_to_ptr.vmem [resolvable:$false] %s1231_s15 }
  0x51   : > { %s1233_s23 = scalar_lea.vmem %s1232_s15, 256  ;;  %p1234_p2 = scmp.lt.s32.totalorder %s1638_s10, %s1232_s15 }
  0x52   : > { %p1229_p5 = pnand %p1227_p13, %p1648_p9  ;;  %p1235_p12 = scmp.lt.s32.totalorder %s1233_s23, %s1226_s21 }
  0x54   : > { %p1230_p10 = pneg %p1229_p5  ;;  %p1236_p1 = por %p1235_p12, %p1234_p2 }
  0x56   : > { %p1237_p3 = pnand %p1236_p1, %p1230_p10 }
  0x58   : > { %1240 = shalt.err (!%p1237_p3)
}
  0x59   : > { %s1934_s12 = smov 192   ;;  %s1936_s19 = smov 64  }
  0x5a   : > { %s1938_s26 = smov 4   ;;  %s1960_s1 = sld [smem:[#allocation28_spill]] }
  0x5b   : > { %1116 = dma.hbm_to_vmem [thread:$0]  (!%p1958_p8), %s1635_s22, 128, %s1638_s10, %s1642_s27, %s1934_s12, %s1936_s19, %s1938_s26  }
  0x5c   : > { %p1961_p2 = scmp.ne.s32.totalorder %s1954_s28, 0 }
  0x5e   : > { %p1962_p0 = pneg %p1961_p2 }
  0x60   : > { %s306_s21 = sshll.u32 %s1960_s1, 4  ;;  %s307_s21 = int_to_ptr.vmem [resolvable:$true] %s306_s21 }
  0x61   : > { %s1241_s15 = scalar_lea.vmem %s307_s21, 16  ;;  %p1249_p7 = scmp.lt.s32.totalorder %s307_s21, %s307_s21 }
  0x62   : > { %p1242_p12 = scmp.ne.s32.totalorder %s307_s21, %s1241_s15  ;;  %p1250_p11 = scmp.lt.s32.totalorder %s1241_s15, %s1241_s15 }
  0x64   : > { %p1244_p6 = pnand %p1242_p12, %p1962_p0  ;;  %p1251_p13 = por %p1250_p11, %p1249_p7 }
  0x66   : > { %p1245_p4 = pneg %p1244_p6 }
  0x68   : > { %p1252_p5 = pnand %p1251_p13, %p1245_p4 }
  0x6a   : > { %1255 = shalt.err (!%p1252_p5)
}
  0x6b   : > { %s1465_s23 = smov [#allocation4]   ;;  %s1963_s2 = sld [smem:[#allocation29_spill]] }
  0x6c   : > { %1106 = dma.vmem_to_smem (!%p1961_p2), %s307_s21, 16, %s1465_s23, [#allocation7]  }
  0x6d   : > { %s340_s14 = scalar_lea.vmem [#allocation8], %s1628_s20  ;;  %s1696_s19 = scalar_lea.hbm %s1915_s4, %s1596_s30 }
  0x6e   : > { %s346_s15 = sshll.u32 %s340_s14, 4  ;;  %s1964_s26 = sand.u32 1, %s1452_s17   ;;  %s1690_s15 = int_to_ptr.vmem [resolvable:$true] %s346_s15 }
  0x6f   : > { %s1700_s21 = scalar_lea.sflag [#allocation5], %s1964_s26 }
  0x71   : > { %s1687_s29 = scalar_lea.hbm %s1963_s2, %s1596_s30  ;;  %s1261_s1 = scalar_lea.hbm %s1963_s2, 384 }
  0x72   : > { %s1256_s23 = scalar_lea.hbm %s1687_s29, 128  ;;  %p1262_p12 = scmp.lt.u32.totalorder %s1687_s29, %s1963_s2 }
  0x73   : > { %p1257_p10 = scmp.ne.s32.totalorder %s1687_s29, %s1256_s23  ;;  %p1263_p2 = scmp.lt.u32.totalorder %s1261_s1, %s1256_s23 }
  0x74   : > { %p1265_p6 = scmp.lt.u32.totalorder %s1256_s23, %s1687_s29 }
  0x75   : > { %p1259_p1 = pnand %p1257_p10, %p1648_p9  ;;  %p1264_p0 = por %p1263_p2, %p1262_p12 }
  0x77   : > { %p1260_p3 = pneg %p1259_p1  ;;  %p1266_p4 = por %p1265_p6, %p1264_p0 }
  0x79   : > { %p1267_p7 = pnand %p1266_p4, %p1260_p3 }
  0x7b   : > { %1270 = shalt.err (!%p1267_p7)
}
  0x7c   : > { %s1271_s12 = scalar_lea.vmem %s1690_s15, 128  ;;  %s1466_s26 = smov [#allocation8]  }
  0x7d   : > { %p1272_p11 = scmp.ne.s32.totalorder %s1690_s15, %s1271_s12  ;;  %s1276_s28 = sshll.u32 %s1466_s26, 4  ;;  %s1277_s28 = int_to_ptr.vmem [resolvable:$false] %s1276_s28 }
  0x7e   : > { %s1278_s3 = scalar_lea.vmem %s1277_s28, 256  ;;  %p1279_p10 = scmp.lt.s32.totalorder %s1690_s15, %s1277_s28 }
  0x7f   : > { %p1274_p13 = pnand %p1272_p11, %p1648_p9  ;;  %p1280_p1 = scmp.lt.s32.totalorder %s1278_s3, %s1271_s12 }
  0x81   : > { %p1275_p5 = pneg %p1274_p13  ;;  %p1281_p12 = por %p1280_p1, %p1279_p10 }
  0x83   : > { %p1282_p2 = pnand %p1281_p12, %p1275_p5 }
  0x85   : > { %1285 = shalt.err (!%p1282_p2)
}
  0x86   : > { %s1965_s1 = smov 4   ;;  %s1966_s23 = smov 64  }
  0x87   : > { %s1967_s10 = smov 192   ;;  %s380_s22 = scalar_lea.vmem [#allocation11], %s1628_s20 }
  0x88   : > { %1113 = dma.hbm_to_vmem [thread:$0]  (!%p1958_p8), %s1687_s29, 128, %s1690_s15, %s1700_s21, %s1967_s10, %s1966_s23, %s1965_s1  }
  0x89   : > { %s386_s14 = sshll.u32 %s380_s22, 4  ;;  %s1734_s28 = scalar_lea.hbm %s1916_s5, %s1596_s30  ;;  %s1728_s14 = int_to_ptr.vmem [resolvable:$true] %s386_s14 }
  0x8a   : > { %s1286_s3 = scalar_lea.hbm %s1696_s19, 128  ;;  %s1291_s17 = scalar_lea.hbm %s1915_s4, 384 }
  0x8b   : > { %p1287_p3 = scmp.ne.s32.totalorder %s1696_s19, %s1286_s3  ;;  %p1292_p4 = scmp.lt.u32.totalorder %s1696_s19, %s1915_s4 }
  0x8c   : > { %p1293_p7 = scmp.lt.u32.totalorder %s1291_s17, %s1286_s3  ;;  %p1295_p13 = scmp.lt.u32.totalorder %s1286_s3, %s1696_s19 }
  0x8d   : > { %p1289_p0 = pnand %p1287_p3, %p1648_p9 }
  0x8e   : > { %p1294_p11 = por %p1293_p7, %p1292_p4 }
  0x8f   : > { %p1290_p6 = pneg %p1289_p0 }
  0x90   : > { %p1296_p5 = por %p1295_p13, %p1294_p11 }
  0x92   : > { %p1297_p10 = pnand %p1296_p5, %p1290_p6 }
  0x94   : > { %1300 = shalt.err (!%p1297_p10)
}
  0x95   : > { %s1301_s30 = scalar_lea.vmem %s1728_s14, 128  ;;  %s1467_s2 = smov [#allocation11]  }
  0x96   : > { %p1302_p1 = scmp.ne.s32.totalorder %s1728_s14, %s1301_s30  ;;  %s1306_s7 = sshll.u32 %s1467_s2, 4  ;;  %s1307_s7 = int_to_ptr.vmem [resolvable:$false] %s1306_s7 }
  0x97   : > { %s1308_s9 = scalar_lea.vmem %s1307_s7, 256  ;;  %p1309_p3 = scmp.lt.s32.totalorder %s1728_s14, %s1307_s7 }
  0x98   : > { %p1304_p12 = pnand %p1302_p1, %p1648_p9  ;;  %p1310_p0 = scmp.lt.s32.totalorder %s1308_s9, %s1301_s30 }
  0x9a   : > { %p1305_p2 = pneg %p1304_p12  ;;  %p1311_p4 = por %p1310_p0, %p1309_p3 }
  0x9c   : > { %p1312_p7 = pnand %p1311_p4, %p1305_p2 }
  0x9e   : > { %1315 = shalt.err (!%p1312_p7)
}
  0x9f   : > { %1119 = dma.hbm_to_vmem [thread:$0]  (!%p1958_p8), %s1696_s19, 128, %s1728_s14, %s1642_s27, %s1967_s10, %s1966_s23, %s1965_s1  }
  0xa0   : > { %s400_s17 = scalar_lea.vmem [#allocation12], %s1628_s20  ;;  %s1968_s21 = sand.u32 1, %s1456_s18  }
  0xa1   : > { %s406_s15 = sshll.u32 %s400_s17, 4  ;;  %s1766_s22 = scalar_lea.sflag [#allocation13], %s1968_s21  ;;  %s1762_s15 = int_to_ptr.vmem [resolvable:$true] %s406_s15 }
  0xa2   : > { %s1316_s12 = scalar_lea.hbm %s1734_s28, 128  ;;  %s1321_s29 = scalar_lea.hbm %s1916_s5, 384 }
  0xa3   : > { %p1317_p6 = scmp.ne.s32.totalorder %s1734_s28, %s1316_s12  ;;  %p1322_p5 = scmp.lt.u32.totalorder %s1734_s28, %s1916_s5 }
  0xa4   : > { %p1323_p10 = scmp.lt.u32.totalorder %s1321_s29, %s1316_s12  ;;  %p1325_p12 = scmp.lt.u32.totalorder %s1316_s12, %s1734_s28 }
  0xa5   : > { %p1319_p11 = pnand %p1317_p6, %p1648_p9 }
  0xa6   : > { %p1324_p1 = por %p1323_p10, %p1322_p5 }
  0xa7   : > { %p1320_p13 = pneg %p1319_p11 }
  0xa8   : > { %p1326_p2 = por %p1325_p12, %p1324_p1 }
  0xaa   : > { %p1327_p3 = pnand %p1326_p2, %p1320_p13 }
  0xac   : > { %1330 = shalt.err (!%p1327_p3)
}
  0xad   : > { %s1331_s18 = scalar_lea.vmem %s1762_s15, 128  ;;  %s1468_s20 = smov [#allocation12]  }
  0xae   : > { %p1332_p0 = scmp.ne.s32.totalorder %s1762_s15, %s1331_s18  ;;  %s1336_s27 = sshll.u32 %s1468_s20, 4  ;;  %s1337_s27 = int_to_ptr.vmem [resolvable:$false] %s1336_s27 }
  0xaf   : > { %s1338_s19 = scalar_lea.vmem %s1337_s27, 256  ;;  %p1339_p6 = scmp.lt.s32.totalorder %s1762_s15, %s1337_s27 }
  0xb0   : > { %p1334_p4 = pnand %p1332_p0, %p1648_p9  ;;  %p1340_p11 = scmp.lt.s32.totalorder %s1338_s19, %s1331_s18 }
  0xb2   : > { %p1335_p7 = pneg %p1334_p4  ;;  %p1341_p5 = por %p1340_p11, %p1339_p6 }
  0xb4   : > { %p1342_p10 = pnand %p1341_p5, %p1335_p7 }
  0xb6   : > { %1345 = shalt.err (!%p1342_p10)
}
  0xb7   : > { %1122 = dma.hbm_to_vmem [thread:$0]  (!%p1958_p8), %s1734_s28, 128, %s1762_s15, %s1766_s22, %s1967_s10, %s1966_s23, %s1965_s1  }
  0xb8   : > { %p1969_p9 = scmp.ne.s32.totalorder %s1953_s25, 0 }
  0xb9   : > { %p1970_p13 = scmp.eq.s32.totalorder (!%p1969_p9), %s1552_s0, 0 }
  0xba   : > { %418 = sbr.rel (%p1969_p9) target bundleno = 1103 (0x44f), region = 56 }
  0xc1   : > { %1415 = dma.done.wait (%p1970_p13), [#allocation7], 16   ;;  %p1971_p1 = pmov %p1970_p13 }
  0xc2   : > { %s424_s13 = sand.u32 1, %s1448_s16   ;;  %p1972_p12 = scmp.ne.s32.totalorder %s1952_s24, 0 }
  0xc3   : > { %1417 = vsyncadd (%p1971_p1), [#allocation7], 4294967280  ;;  %s1800_s11 = sshll.u32 %s424_s13, 3  ;;  %s425_s14 = scalar_lea.sflag [#allocation5], %s424_s13 }
  0xc4   : > { %s428_s7 = scalar_lea.vmem [#allocation8], %s1800_s11 }
  0xc5   : > { %1419 = dma.done.wait (%p1972_p12), %s425_s14, 128  }
  0xc6   : > { %1421 = vsyncadd (%p1972_p12), %s425_s14, 4294967168  ;;  %s433_s25 = sand.u32 1, %s1552_s0   ;;  %s437_s23 = scalar_lea.vmem [#allocation9], %s1800_s11 }
  0xc7   : > { %s434_s1 = scalar_lea.sflag [#allocation10], %s433_s25 }
  0xc8   : > { %1423 = dma.done.wait (%p1972_p12), %s434_s1, 256  }
  0xc9   : > { %1425 = vsyncadd (%p1972_p12), %s434_s1, 4294967040  ;;  %s446_s10 = scalar_lea.vmem [#allocation11], %s1800_s11  ;;  %s452_s28 = scalar_lea.sflag [#allocation13], %s433_s25 }
  0xca   : > { %s455_s9 = scalar_lea.vmem [#allocation12], %s1800_s11 }
  0xcb   : > { %1427 = dma.done.wait (%p1972_p12), %s452_s28, 128  }
  0xcc   : > { %1429 = vsyncadd (%p1972_p12), %s452_s28, 4294967168  ;;  %p1973_p8 = pmov %p1971_p1 }
  0xcd   : > { %p1974_p2 = pmov %p1971_p1 }
  0xce   : > { %1431 = dma.done.wait (%p1973_p8), [#allocation13], 1024  }
  0xcf   : > { %1433 = vsyncadd (%p1974_p2), [#allocation13], 4294966272 }
  0xd0   : > { %464 = sfence }
  0xd1   : > { %p1975_p3 = scmp.ne.s32.totalorder %s1552_s0, 0 }
  0xd2   : > { %vm511_vm0 = vcmask (!%p1975_p3), 254976   ;;  %v1469_v0 = vmov (!%p1975_p3), 0.0  }
  0xd3   : > { %510 = sbr.rel (%p1975_p3) target bundleno = 218 (0xda), region = 84  ;;  %512 = vst.msk [vmem:[#allocation2] sm:$0x3] (!%p1975_p3), %vm511_vm0, %v1469_v0 }
  0xda PF: > { %s1825_s17 = sld [smem:[#allocation3]]  ;;  %v1012_v1 = vld [vmem:[%s428_s7] sm:$0xff]   ;;  %v1016_v2 = vld [vmem:[%s437_s23] sm:$0xff]   ;;  %v536_v4 = vlaneseq  ;;  %s999_s24 = sshll.u32 %s1552_s0, 3  ;;  %vm546_vm2 = vcmask 261120   ;;  %vm563_vm3 = vcmask 1041409  }
  0xdb   : > { %v1020_v3 = vld [vmem:[%s446_s10] sm:$0xff]   ;;  %v1013_v5 = vunpack.c.l.bf16 %v1012_v1  ;;  %v1014_v6 = vunpack.c.h.bf16 %v1012_v1  ;;  %v1017_v7 = vunpack.c.l.bf16 %v1016_v2  ;;  %v1018_v8 = vunpack.c.h.bf16 %v1016_v2  ;;  %v1024_v9 = vld [vmem:[%s455_s9] sm:$0xff]   ;;  %p1000_p0 = scmp.ne.s32.totalorder %s1552_s0, 2 }
  0xdc   : > { %v1021_v10 = vunpack.c.l.bf16 %v1020_v3  ;;  %v1022_v11 = vunpack.c.h.bf16 %v1020_v3  ;;  %v1025_v12 = vunpack.c.l.bf16 %v1024_v9  ;;  %v1026_v13 = vunpack.c.h.bf16 %v1024_v9  ;;  %v545_v38 = vld [vmem:[#allocation2] sm:$0x3]  ;;  %v585_v43 = vld [vmem:[#allocation14 + $0x20] sm:$0xff] (!%p1000_p0)  ;;  %v586_v44 = vld [vmem:[#allocation14 + $0x28] sm:$0xff] (!%p1000_p0)  ;;  %s1004_s26 = sld [smem:[#allocation4 + $0x1]] (!%p1000_p0)  ;;  %s773_s3 = sld [smem:[#allocation4]] (!%p1000_p0) }
  0xdd   : > { %v522_v14 = vadd.f32 %v1017_v7, %v1013_v5  ;;  %v523_v15 = vadd.f32 %v1018_v8, %v1014_v6  ;;  %v537_v16 = vshrl.u32 %v536_v4, 7  ;;  %v539_v17 = vstv %s999_s24  ;;  %v581_v45 = vld [vmem:[#allocation14] sm:$0xff] (!%p1000_p0)  ;;  %v582_v48 = vld [vmem:[#allocation14 + $0x8] sm:$0xff] (!%p1000_p0)  ;;  %v587_v49 = vld [vmem:[#allocation14 + $0x30] sm:$0xff] (!%p1000_p0) }
  0xde   : > { %vm567_vm4 = vcmask 254976   ;;  %v1470_v46 = vmov (!%p1000_p0), 0.0|0.0   ;;  %v1060_v47 = vpack.c.bf16 (!%p1000_p0), %v586_v44, %v585_v43  ;;  %v1066_v51 = vpack.c.bf16 (!%p1000_p0), %v582_v48, %v581_v45  ;;  %v588_v52 = vld [vmem:[#allocation14 + $0x38] sm:$0xff] (!%p1000_p0)  ;;  %v583_v53 = vld [vmem:[#allocation14 + $0x10] sm:$0xff] (!%p1000_p0) }
  0xdf   : > { %v528_v18 = vadd.f32 %v1021_v10, %v522_v14  ;;  %v529_v19 = vadd.f32 %v1022_v11, %v523_v15  ;;  %v540_v20 = vadd.s32 %v539_v17, %v537_v16  ;;  %1059 = vmatprep.subr.bf16.mxu0 (!%p1000_p0), %v1470_v46  ;;  %1065 = vmatprep.subr.bf16.mxu1 (!%p1000_p0), %v1470_v46  ;;  %v584_v54 = vld [vmem:[#allocation14 + $0x18] sm:$0xff] (!%p1000_p0)  ;;  %vm1471_vm5 = vmmov (!%p1000_p0), 0  }
  0xe0   : > { %v541_v21 = vstv %s1825_s17  ;;  %s573_s15 = scvt.s32.f32 (!%p1000_p0), %s1825_s17  ;;  %v1472_v55 = vmov (!%p1000_p0), 0.0   ;;  %1061 = vmatpush3.bf16.msra.mxu0 (!%p1000_p0), %v1060_v47  ;;  %v1063_v56 = vpack.c.bf16 (!%p1000_p0), %v588_v52, %v587_v49  ;;  %1067 = vmatpush3.bf16.msra.mxu1 (!%p1000_p0), %v1066_v51  ;;  %v1069_v57 = vpack.c.bf16 (!%p1000_p0), %v584_v54, %v583_v53  ;;  %v580_v58 = vld [vmem:[%s1917_s6] sm:$0x3] (!%p1000_p0) }
  0xe1   : > { %v534_v22 = vadd.f32 %v1025_v12, %v528_v18  ;;  %v535_v23 = vadd.f32 %v1026_v13, %v529_v19  ;;  %vm542_vm1 = vcmp.lt.s32.totalorder %v540_v20, %v541_v21  ;;  %1045 = vmatprep.mubr.msk.f32.mxu0 (!%p1000_p0), %vm1471_vm5, %v1472_v55  ;;  %1056 = vmatprep.mubr.msk.f32.mxu1 (!%p1000_p0), %vm1471_vm5, %v1472_v55  ;;  %v745_v1 = vand.u32 (!%p1000_p0), 127, %v536_v4  ;;  %v1003_v6 = vld [vmem:[%s1919_s8] ss:$0 sm:$0xff] (!%p1000_p0) }
  0xe2   : > { %v574_v50 = vstv (!%p1000_p0), %s573_s15  ;;  %1062 = vmatprep.subr.bf16.mxu0 (!%p1000_p0), %v1470_v46  ;;  %1068 = vmatprep.subr.bf16.mxu1 (!%p1000_p0), %v1470_v46  ;;  %v790_v2 = vstv (!%p1000_p0), %s1004_s26  ;;  %v774_v3 = vstv (!%p1000_p0), %s773_s3  ;;  %vm748_vm9 = vcmask (!%p1000_p0), 1041408  }
  0xe3   : > { %v543_v24 = vsel %vm542_vm1, %v534_v22, 0.0  ;;  %v544_v25 = vsel %vm542_vm1, %v535_v23, 0.0  ;;  %1177 = vrcp.f32 (!%p1000_p0), %v574_v50  ;;  %vm746_vm6 = vcmp.lt.s32.totalorder (!%p1000_p0), %v745_v1, 2 }
  0xe4   : > { %v547_v26 = vsel %vm546_vm2, %v543_v24, 0.0  ;;  %v554_v27 = vsel %vm546_vm2, %v544_v25, 0.0  ;;  %1064 = vmatpush3.bf16.msra.mxu0 (!%p1000_p0), %v1063_v56  ;;  %1070 = vmatpush3.bf16.msra.mxu1 (!%p1000_p0), %v1069_v57  ;;  %vm1843_vm7 = vcmp.eq.s32.totalorder (!%p1000_p0), %v745_v1, %v790_v2  ;;  %vm775_vm8 = vcmp.eq.s32.totalorder (!%p1000_p0), %v745_v1, %v774_v3 }
  0xe5   : > { %v548_v28 = vrot.slane %v547_v26, 4  ;;  %v555_v29 = vrot.slane %v554_v27, 4  ;;  %vm777_vm10 = vcmask (!%p1000_p0), 1040384   ;;  %vm762_vm11 = vcmask (!%p1000_p0), 1024  }
  0xe6   : > { %vm810_vm12 = vcmask (!%p1000_p0), 0  }
  0xe7   : > { %v549_v30 = vadd.f32 %v548_v28, %v547_v26  ;;  %v556_v31 = vadd.f32 %v555_v29, %v554_v27  ;;  %1046 = vmatmul.mubr.msk.f32.vlgmr.msra.gmra.mrb[0].mxu0 (!%p1000_p0), %vm546_vm2, %v580_v58 }
  0xe9   : > { %v550_v32 = vrot.slane %v549_v30, 2  ;;  %v557_v33 = vrot.slane %v556_v31, 2 }
  0xeb   : > { %v551_v34 = vadd.f32 %v550_v32, %v549_v30  ;;  %v558_v35 = vadd.f32 %v557_v33, %v556_v31 }
  0xed   : > { %v552_v36 = vrot.slane %v551_v34, 1  ;;  %v559_v37 = vrot.slane %v558_v35, 1  ;;  %v1178_v59 = vpop.eup (!%p1000_p0), %1177 }
  0xee   : > { %572 = sbr.rel (%p1000_p0) target bundleno = 1043 (0x413), region = 88  ;;  %1071 = vpush (!%p1000_p0), %v1178_v59 }
  0xef   : > { %v553_v39 = vadd.f32 %v552_v36, %v551_v34  ;;  %v560_v40 = vadd.f32 %v559_v37, %v558_v35 }
  0xf1   : > { %v564_v41 = vsel %vm563_vm3, %v560_v40, %v553_v39 }
  0xf2   : > { %v566_v42 = vadd.f32 %v564_v41, %v545_v38 }
  0xf4   : > { %568 = vst.msk [vmem:[#allocation2] sm:$0x3] %vm567_vm4, %v566_v42 }
  0xfb   : > { %v577_v60 = vld [vmem:[#allocation2] sm:$0x3] }
 0x11f   : > { %s1072_s12 = spop %1071 }
 0x120   : > { %v578_v61 = vstv %s1072_s12 }
 0x121   : > { %v579_v62 = vmul.f32 %v578_v61, %v577_v60 }
 0x123   : > { %1057 = vmatmul.mubr.msk.f32.vlgmr.msra.gmra.mrb[0].mxu1 %vm546_vm2, %v579_v62 }
 0x1ba   : > { %v658_v63 = vpop.f32.mrb[0].mxu0 }
 0x1bb   : > { %v1047_v0 = vpop.f32.mrb[1].mxu0 }
 0x1f6   : > { %v731_v5 = vpop.f32.mrb[0].mxu1 }
 0x1f7   : > { %v732_v7 = vadd.f32 %v731_v5, %v658_v63  ;;  %v1058_v8 = vpop.f32.mrb[1].mxu1 }
 0x1f9   : > { %v742_v10 = vadd.f32 %v1003_v6, %v732_v7 }
 0x1fb   : > { %743 = vst [vmem:[#allocation15] sm:$0x3] %v742_v10  ;;  %v747_v4 = vsel %vm746_vm6, %v742_v10, -inf  ;;  %v792_v11 = vsel %vm1843_vm7, %v742_v10, 0.0  ;;  %v776_v12 = vsel %vm775_vm8, %v742_v10, 0.0 }
 0x1fc   : > { %v749_v13 = vsel %vm748_vm9, %v747_v4, -inf  ;;  %v778_v14 = vsel %vm777_vm10, %v776_v12, 0.0  ;;  %v794_v21 = vrot.slane %v792_v11, 1 }
 0x1fd   : > { %750 = vmax.xlane.f32.xlu0 %v749_v13 }
 0x1fe   : > { %v796_v22 = vsel %vm777_vm10, %v794_v21, 0.0 }
 0x28a   : > { %v751_v15 = vpop.xlane.xlu0 %750 }
 0x28b   : > { %v752_v16 = vsub.f32 %v747_v4, %v751_v15 }
 0x28d   : > { %v753_v17 = vmul.f32 1.442695, %v752_v16 }
 0x28f   : > { %1179 = vpow2.f32 %v753_v17 }
 0x299   : > { %v1180_v18 = vpop.eup %1179 }
 0x29a   : > { %v755_v19 = vsel %vm746_vm6, %v1180_v18, 0.0 }
 0x29b   : > { %v756_v20 = vsel %vm748_vm9, %v755_v19, 0.0 }
 0x29c   : > { %757 = vadd.xlane.f32.xlu0 %v756_v20 }
 0x2a0   : > { %797 = vadd.xlane.f32.xlu0 %v796_v22 }
 0x329   : > { %v758_v23 = vpop.xlane.xlu0 %757 }
 0x32a   : > { %1181 = vlog2.f32 %v758_v23 }
 0x32d   : > { %v798_v28 = vpop.xlane.xlu0 %797 }
 0x32e   : > { %v799_v29 = vrot.slane %v798_v28, 4 }
 0x330   : > { %v800_v30 = vadd.f32 %v799_v29, %v798_v28 }
 0x332   : > { %v801_v34 = vrot.slane %v800_v30, 2 }
 0x334   : > { %v1182_v24 = vpop.eup %1181  ;;  %v802_v40 = vadd.f32 %v801_v34, %v800_v30 }
 0x335   : > { %v760_v25 = vmul.f32 0.6931472, %v1182_v24 }
 0x336   : > { %v803_v45 = vrot.slane %v802_v40, 1 }
 0x337   : > { %v761_v26 = vadd.f32 %v760_v25, %v751_v15 }
 0x338   : > { %v804_v48 = vadd.f32 %v803_v45, %v802_v40 }
 0x339   : > { %v763_v27 = vsel %vm762_vm11, %v761_v26, 0.0 }
 0x33a   : > { %764 = vadd.xlane.f32.xlu1 %v763_v27 }
 0x33e   : > { %779 = vadd.xlane.f32.xlu1 %v778_v14 }
 0x3c7   : > { %v765_v31 = vpop.xlane.xlu1 %764 }
 0x3c8   : > { %v766_v32 = vrot.slane %v765_v31, 4 }
 0x3ca   : > { %v767_v33 = vadd.f32 %v766_v32, %v765_v31 }
 0x3cb   : > { %v780_v35 = vpop.xlane.xlu1 %779 }
 0x3cc   : > { %v768_v36 = vrot.slane %v767_v33, 2  ;;  %v781_v37 = vrot.slane %v780_v35, 4 }
 0x3ce   : > { %v782_v38 = vadd.f32 %v781_v37, %v780_v35  ;;  %v769_v39 = vadd.f32 %v768_v36, %v767_v33 }
 0x3d0   : > { %v783_v41 = vrot.slane %v782_v38, 2  ;;  %v770_v42 = vrot.slane %v769_v39, 1 }
 0x3d2   : > { %v784_v43 = vadd.f32 %v783_v41, %v782_v38  ;;  %v771_v44 = vadd.f32 %v770_v42, %v769_v39 }
 0x3d4   : > { %1073 = vpush %v771_v44  ;;  %v785_v46 = vrot.slane %v784_v43, 1 }
 0x3d6   : > { %v786_v47 = vadd.f32 %v785_v46, %v784_v43 }
 0x3d8   : > { %1075 = vpush %v786_v47 }
 0x3d9   : > { %1077 = vpush %v804_v48 }
 0x405   : > { %s1074_s2 = spop %1073 }
 0x409   : > { %s1076_s18 = spop %1075 }
 0x40a   : > { %s1078_s20 = spop %1077 }
 0x40b   : > { %s806_s27 = sadd.f32 %s1078_s20, %s1076_s18 }
 0x40d   : > { %s807_s19 = ssub.f32 %s1074_s2, %s806_s27 }
 0x40f   : > { %s808_s13 = smul.f32 0.5, %s807_s19 }
 0x411   : > { %v809_v49 = vstv %s808_s13 }
 0x412   : > { %811 = vst.msk [vmem:[#allocation16] sm:$0x1] %vm810_vm12, %v809_v49 }
 0x413 PF: > { %p1128_p4 = scmp.eq.s32.totalorder %s1552_s0, 2  ;;  %s1473_s11 = smov [#allocation15]  }
 0x414   : > { %s819_s14 = sshll.u32 %s1473_s11, 4  ;;  %s1474_s7 = smov [#allocation16]   ;;  %s820_s14 = int_to_ptr.vmem [resolvable:$true] %s819_s14 }
 0x415   : > { %s830_s25 = sshll.u32 %s1474_s7, 4  ;;  %s1346_s1 = scalar_lea.vmem %s820_s14, 32  ;;  %s831_s25 = int_to_ptr.vmem [resolvable:$true] %s830_s25 }
 0x416   : > { %p1347_p7 = scmp.ne.s32.totalorder %s820_s14, %s1346_s1  ;;  %p1353_p5 = scmp.lt.s32.totalorder %s820_s14, %s820_s14 }
 0x417   : > { %p1354_p10 = scmp.lt.s32.totalorder %s1346_s1, %s1346_s1 }
 0x418   : > { %p1348_p6 = pnand %p1347_p7, %p1128_p4 }
 0x419   : > { %p1355_p9 = por %p1354_p10, %p1353_p5 }
 0x41a   : > { %p1349_p11 = pneg %p1348_p6 }
 0x41c   : > { %p1356_p13 = pnand %p1355_p9, %p1349_p11 }
 0x41e   : > { %1359 = shalt.err (!%p1356_p13)
}
 0x41f   : > { %s1978_s28 = sld [smem:[#allocation32_spill]] }
 0x425   : > { %s1360_s9 = scalar_lea.hbm %s1978_s28, 32 }
 0x426   : > { %p1361_p1 = scmp.ne.s32.totalorder %s1978_s28, %s1360_s9  ;;  %p1366_p2 = scmp.lt.u32.totalorder %s1360_s9, %s1978_s28 }
 0x428   : > { %p1362_p12 = pnand %p1361_p1, %p1128_p4 }
 0x42a   : > { %p1363_p8 = pneg %p1362_p12 }
 0x42c   : > { %p1368_p3 = pnand %p1366_p2, %p1363_p8 }
 0x42e   : > { %1371 = shalt.err (!%p1368_p3)
}
 0x42f   : > { %1096 = dma.vmem_to_hbm [thread:$0]  (%p1128_p4), %s820_s14, 32, %s1978_s28, [#allocation6]  }
 0x430   : > { %s1372_s26 = scalar_lea.vmem %s831_s25, 16  ;;  %s1378_s3 = scalar_lea.vmem %s831_s25, 32 }
 0x431   : > { %p1373_p0 = scmp.ne.s32.totalorder %s831_s25, %s1372_s26  ;;  %p1379_p11 = scmp.lt.s32.totalorder %s831_s25, %s831_s25 }
 0x432   : > { %p1380_p5 = scmp.lt.s32.totalorder %s1378_s3, %s1372_s26 }
 0x433   : > { %p1374_p7 = pnand %p1373_p0, %p1128_p4 }
 0x434   : > { %p1381_p10 = por %p1380_p5, %p1379_p11 }
 0x435   : > { %p1375_p6 = pneg %p1374_p7 }
 0x437   : > { %p1382_p9 = pnand %p1381_p10, %p1375_p6 }
 0x439   : > { %1385 = shalt.err (!%p1382_p9)
}
 0x43a   : > { %s1979_s2 = sld [smem:[#allocation33_spill]] }
 0x440   : > { %s1386_s18 = scalar_lea.hbm %s1979_s2, 16 }
 0x441   : > { %p1387_p13 = scmp.ne.s32.totalorder %s1979_s2, %s1386_s18  ;;  %p1392_p8 = scmp.lt.u32.totalorder %s1386_s18, %s1979_s2 }
 0x443   : > { %p1388_p1 = pnand %p1387_p13, %p1128_p4 }
 0x445   : > { %p1389_p12 = pneg %p1388_p1 }
 0x447   : > { %p1394_p2 = pnand %p1392_p8, %p1389_p12 }
 0x449   : > { %1397 = shalt.err (!%p1394_p2)
}
 0x44a   : > { %1098 = dma.vmem_to_hbm [thread:$0]  (%p1128_p4), %s831_s25, 16, %s1979_s2, [#allocation17]  }
 0x44b   : > { %1435 = dma.done.wait (%p1128_p4), [#allocation6], 32  }
 0x44c   : > { %1437 = vsyncadd (%p1128_p4), [#allocation6], 4294967264 }
 0x44d   : > { %1439 = dma.done.wait (%p1128_p4), [#allocation17], 16  }
 0x44e   : > { %1441 = vsyncadd (%p1128_p4), [#allocation17], 4294967280 }
 0x44f PF: > { %s1980_s18 = sld [smem:[#allocation26_spill]]  ;;  %s1981_s7 = sld [smem:[#allocation25_spill]] }
 0x450   : > { %s1982_s17 = sld [smem:[#allocation27_spill]]  ;;  %s1983_s15 = smov %s1448_s16 }
 0x455   : > { %p31_p3 = scmp.ge.s32.totalorder %s1980_s18, 5   ;;  %s1984_s16 = smov %s1981_s7 }
 0x457   :  { %33 = sbr.rel (!%p31_p3) target bundleno = 18 (0x12), region = 155 }
 0x45e   :  { %847 = vsyncpa [#allocation5], 1 }
 0x45f   :  { %849 = vsyncpa [#allocation5 + $0x1], 1 }
 0x460   :  { %850 = vsyncpa [#allocation10], 1 }
 0x461   :  { %852 = vsyncpa [#allocation10 + $0x1], 1 }
 0x462   :  { %853 = vsyncpa [#allocation13], 1 }
 0x463   :  { %855 = vsyncpa [#allocation13 + $0x1], 1 }
 0x464   :  { %856 = vsyncpa [#allocation6], 1 }
 0x465   :  { %858 = vsyncpa [#allocation6 + $0x1], 1 }
 0x466   :  { %859 = vsyncpa [#allocation17], 1 }
 0x467   :  { %860 = vsyncpa [#allocation7], 1 }
 0x468   :  { %862 = vsyncpa [#allocation7 + $0x1], 1 }

</bundles_post_ra>
